<compile_context>
chip_gen: v6e
topology: v6e:2x2x1
jax: 0.10.0
libtpu: 0.0.40
codegen_flags: <defaults>
</compile_context>

<pallas_src>
import functools

import jax
import jax.numpy as jnp
from jax.experimental import pallas as pl
from jax.experimental.pallas import tpu as pltpu


# ----------------------------------------------------------------------------- kernels


def _upsample_full_kernel(x_ref, up_ref, o_ref, *, precision):
    # o = x @ up, with `up` the (block-diagonal) 0/1 interleave matrix resident
    # in VMEM.  Exact: every output element is 1.0 * x[..] plus zeros.
    o_ref[...] = jnp.dot(
        x_ref[...],
        up_ref[...],
        preferred_element_type=o_ref.dtype,
        precision=precision,
    )


def _upsample_halved_kernel(x_ref, up_ref, o_ref, *, precision):
    # dup = x @ up gives the column-duplicated row (width 2W); the output row is
    # [dup | dup], so the MXU does half the flops of the full (W, 4W) matrix.
    dup = jnp.dot(
        x_ref[...],
        up_ref[...],
        preferred_element_type=o_ref.dtype,
        precision=precision,
    )
    w2 = up_ref.shape[-1]
    o_ref[:, :w2] = dup
    o_ref[:, w2:] = dup


# ----------------------------------------------------------------------------- planning

_ROW_ALIGN = 32        # row-block alignment (safe sublane multiple for f32/bf16/fp16)
_MIN_GRID_STEPS = 8    # keep >= ~4 pipelined steps per TensorCore when possible


def _vmem_capacity_bytes() -> int:
    try:
        return int(pltpu.get_tpu_info().vmem_capacity_bytes)
    except Exception:
        return 64 * 1024 * 1024   # conservative default (v7x-sized); correct everywhere


def _pick_fold(total_rows: int, w: int):
    """Return (k, use_halved).

    Wide inputs (2W >= 128 lanes) use the halved (W, 2W) matrix + double store.
    Narrow inputs fold k rows per kernel row (block-diagonal (kW, 4kW) matrix)
    so the single output store is a >=128-lane unmasked slab.
    """
    if 2 * w >= 128:
        return 1, True
    k_target = max(1, -(-128 // (4 * w)))          # ceil(128 / (4W))
    for k in range(k_target, min(total_rows, 8 * k_target) + 1):
        if total_rows % k == 0:
            return k, False
    return 1, False                                 # no clean fold: sub-128-lane stores


def _pick_row_block(total_rows: int, bytes_per_row: int, payload_target: int) -> int:
    rb = max(1, payload_target // max(1, bytes_per_row))
    # Enough grid steps to pipeline (and keep both v7x TensorCores streaming)
    # when the problem is big enough; tiny problems stay a single block.
    if total_rows >= _MIN_GRID_STEPS * _ROW_ALIGN:
        rb = min(rb, pl.cdiv(total_rows, _MIN_GRID_STEPS))
    if rb >= total_rows:
        return total_rows                           # single full block (always legal)
    rb = max(8, (rb // 8) * 8)                      # partial-cover blocks: 8-row aligned
    if rb > _ROW_ALIGN:
        rb = (rb // _ROW_ALIGN) * _ROW_ALIGN
    return min(rb, total_rows)


def _repeat2x_ref(x):
    return jnp.repeat(jnp.repeat(x, 2, axis=2), 2, axis=3)


# ----------------------------------------------------------------------------- wrapper


@jax.jit
def interpolate_nearest_2x(x):
    """x: (N, C, H, W) -> (N, C, 2H, 2W), nearest neighbor (PyTorch default mode)."""
    if x.ndim != 4:
        raise NotImplementedError("Only 4-D NCHW inputs are supported.")
    n, c, h, w = x.shape
    dtype = x.dtype

    if not jnp.issubdtype(dtype, jnp.floating):
        # TODO(synk): integer inputs use the bit-exact pure-JAX path; a copy-based
        # Pallas interleave would be needed to keep them on-chip.
        return _repeat2x_ref(x)

    itemsize = jnp.dtype(dtype).itemsize
    total_rows = n * c * h

    vmem_cap = _vmem_capacity_bytes()
    vmem_budget = int(0.75 * vmem_cap)                        # headroom for compiler scratch
    base_payload = (8 << 20) if vmem_cap <= (64 << 20) else (14 << 20)

    k, use_halved = _pick_fold(total_rows, w)
    rows = total_rows // k
    in_w = k * w
    out_w = 4 * k * w
    up_w = 2 * w if use_halved else out_w
    up_bytes = in_w * up_w * itemsize

    if up_bytes > vmem_budget // 2:
        # TODO(synk): pathologically wide W would need a chunked-lane interleave
        # instead of one resident up matrix; fall back to plain XLA there.
        return _repeat2x_ref(x)

    # Per-step payload (in + out block), shrunk if the resident up matrix is big.
    payload_target = min(base_payload, max(1 << 20, (vmem_budget - 2 * up_bytes) // 3))
    bytes_per_row = (in_w + out_w) * itemsize
    row_block = _pick_row_block(rows, bytes_per_row, payload_target)
    grid = (pl.cdiv(rows, row_block),)

    # Exact 0/1 interleave matrix, built once on the host (never rebuilt per step).
    if use_halved:
        # up[i, 2i] = up[i, 2i+1] = 1   ->   (x @ up)[r, j] = x[r, j // 2]
        src = jnp.arange(up_w, dtype=jnp.int32) // 2
    else:
        # Block-diagonal: output column o of a folded row reads input column
        #   (o // 4W) * W + ((o mod 4W) mod 2W) // 2
        o_idx = jnp.arange(up_w, dtype=jnp.int32)
        src = (o_idx // (4 * w)) * w + ((o_idx % (4 * w)) % (2 * w)) // 2
    up = (src[None, :] == jnp.arange(in_w, dtype=jnp.int32)[:, None]).astype(dtype)

    # VMEM plan: double-buffered in/out blocks + (double-buffered) up + dup intermediate.
    in_blk = row_block * in_w * itemsize
    out_blk = row_block * out_w * itemsize
    interm = row_block * up_w * itemsize if use_halved else 0
    need = 2 * (in_blk + out_blk) + 2 * up_bytes + interm + (2 << 20)
    vmem_limit = int(min(vmem_budget, max(2 * need, 32 << 20)))

    # Pin precision for f32 so the 0/1 matmul is a bit-exact copy on every generation.
    precision = jax.lax.Precision.HIGHEST if dtype == jnp.float32 else None
    kernel_fn = _upsample_halved_kernel if use_halved else _upsample_full_kernel
    kernel = functools.partial(kernel_fn, precision=precision)

    x2 = x.reshape(rows, in_w)                               # metadata-only reshape

    out2 = pl.pallas_call(
        kernel,
        out_shape=jax.ShapeDtypeStruct((rows, out_w), dtype),
        grid_spec=pltpu.PrefetchScalarGridSpec(
            num_scalar_prefetch=0,
            grid=grid,
            in_specs=[
                pl.BlockSpec((row_block, in_w), lambda i: (i, 0)),
                pl.BlockSpec((in_w, up_w), lambda i: (0, 0)),   # constant index: resident
            ],
            out_specs=pl.BlockSpec((row_block, out_w), lambda i: (i, 0)),
        ),
        compiler_params=pltpu.CompilerParams(
            dimension_semantics=("parallel",),
            vmem_limit_bytes=vmem_limit,
        ),
        cost_estimate=pl.CostEstimate(
            flops=2 * rows * in_w * up_w,
            transcendentals=0,
            bytes_accessed=int(5 * x.size * itemsize + up_bytes),
        ),
    )(x2, up)

    return out2.reshape(n, c, 2 * h, 2 * w)                  # metadata-only reshape


# ----------------------------------------------------------------------------- test


if __name__ == "__main__":
    key = jax.random.PRNGKey(0)

    # Primary shape from the module spec: (N=2, C=4, H=16, W=16) -> folded path.
    x = jax.random.normal(key, (2, 4, 16, 16), dtype=jnp.float32)
    out = jax.block_until_ready(interpolate_nearest_2x(x))
    ref = _repeat2x_ref(x)
    assert out.shape == (2, 4, 32, 32), out.shape
    assert out.dtype == x.dtype, out.dtype
    assert jnp.allclose(out, ref, rtol=1e-5, atol=1e-6), float(jnp.max(jnp.abs(out - ref)))

    # Second small shape exercising the wide-W halved path (W=64 -> (W, 2W) matrix).
    key2 = jax.random.PRNGKey(1)
    x2 = jax.random.normal(key2, (1, 2, 8, 64), dtype=jnp.float32)
    out2 = jax.block_until_ready(interpolate_nearest_2x(x2))
    ref2 = _repeat2x_ref(x2)
    assert out2.shape == (1, 2, 16, 128), out2.shape
    assert jnp.allclose(out2, ref2, rtol=1e-5, atol=1e-6), float(jnp.max(jnp.abs(out2 - ref2)))

    print("KERNEL_OK")
</pallas_src>

<mosaic_0001>
module attributes {stable_mosaic.version = 11 : i64} {
  func.func @_upsample_full_kernel(%arg0: i32, %arg1: memref<64x32xf32, #tpu.memory_space<vmem>>, %arg2: memref<32x128xf32, #tpu.memory_space<vmem>>, %arg3: memref<64x128xf32, #tpu.memory_space<vmem>>) attributes {dimension_semantics = [#tpu.dimension_semantics<parallel>], iteration_bounds = array<i64: 1>, scalar_prefetch = 0 : i64, scratch_operands = 0 : i64, tpu.core_type = #tpu.core_type<tc>, window_params = [{transform_indices = @transform_0, window_bounds = array<i64: 64, 32>}, {pipeline_mode = #tpu.pipeline_mode<synchronous>, transform_indices = @transform_1, window_bounds = array<i64: 32, 128>}, {transform_indices = @transform_2, window_bounds = array<i64: 64, 128>}]} {
    %c0 = arith.constant 0 : index
    %c0_0 = arith.constant 0 : index
    %0 = vector.load %arg1[%c0, %c0_0] : memref<64x32xf32, #tpu.memory_space<vmem>>, vector<64x32xf32>
    %c0_1 = arith.constant 0 : index
    %c0_2 = arith.constant 0 : index
    %1 = vector.load %arg2[%c0_1, %c0_2] : memref<32x128xf32, #tpu.memory_space<vmem>>, vector<32x128xf32>
    %cst = arith.constant dense<0.000000e+00> : vector<64x128xf32>
    %2 = tpu.matmul %0, %1, %cst {dimension_numbers = #tpu.dot_dimension_numbers<[1], [0], [0], [1], [0, 0, 1, 1], [], []>, precision = #tpu.contract_precision<fp32>} : vector<64x32xf32>, vector<32x128xf32>, vector<64x128xf32> -> vector<64x128xf32>
    %c0_3 = arith.constant 0 : index
    %c0_4 = arith.constant 0 : index
    %3 = vector.load %arg3[%c0_3, %c0_4] : memref<64x128xf32, #tpu.memory_space<vmem>>, vector<64x128xf32>
    tpu.vector_store %arg3[%c0_3, %c0_4], %2 {strides = array<i32>} : memref<64x128xf32, #tpu.memory_space<vmem>>, vector<64x128xf32>,
    return
  }
  func.func @transform_0(%arg0: i32) -> (i32, i32) {
    %c0_i32 = arith.constant 0 : i32
    %c0_i32_0 = arith.constant 0 : i32
    return %arg0, %c0_i32 : i32, i32
  }
  func.func @transform_1(%arg0: i32) -> (i32, i32) {
    %c0_i32 = arith.constant 0 : i32
    %c0_i32_0 = arith.constant 0 : i32
    %c0_i32_1 = arith.constant 0 : i32
    return %c0_i32, %c0_i32_0 : i32, i32
  }
  func.func @transform_2(%arg0: i32) -> (i32, i32) {
    %c0_i32 = arith.constant 0 : i32
    %c0_i32_0 = arith.constant 0 : i32
    return %arg0, %c0_i32 : i32, i32
  }
}

</mosaic_0001>

<bundles_post_ra>
// kernel: interpolate_nearest_2x.1
= control target key start
LH: loop header
LB: loop body
LE: loop exit
PB: predicated region body
PF: predicated region fallthrough
CT: control target
= control target key end

     0   :  { %vm23_vm0 = vcmask 261120   ;;  %s1309_s1 = inlined_call_operand.vmem [shape: f32[32,128], index: 1, kind: input, shape index: {}]   ;;  %s1310_s0 = inlined_call_operand.vmem [shape: f32[64,32], index: 0, kind: input, shape index: {}]   ;;  %s1311_s2 = inlined_call_operand.vmem [shape: f32[64,128], index: 2, kind: output, shape index: {}]  }
   0x1   :  { %v22_v0 = vld [vmem:[%s1309_s1 + $0x18] sm:$0xff]  ;;  %v21_v1 = vld [vmem:[%s1309_s1 + $0x10] sm:$0xff]  ;;  %v20_v2 = vld [vmem:[%s1309_s1 + $0x8] sm:$0xff] }
   0x2   :  { %v1062_v3 = vand.u32 4294901760, %v22_v0  ;;  %v1064_v4 = vand.u32 4294901760, %v21_v1  ;;  %v1066_v5 = vand.u32 4294901760, %v20_v2  ;;  %v19_v6 = vld [vmem:[%s1309_s1] sm:$0xff]  ;;  %v12_v8 = vld [vmem:[%s1310_s0 + $0x8] sm:$0xff]  ;;  %v13_v12 = vld [vmem:[%s1310_s0 + $0x10] sm:$0xff] }
   0x3   :  { %v11_v7 = vld [vmem:[%s1310_s0] sm:$0xff]  ;;  %v1077_v9 = vand.u32 4294901760, %v19_v6  ;;  %v28_v11 = vsel %vm23_vm0, %v12_v8, 0  ;;  %v14_v13 = vld [vmem:[%s1310_s0 + $0x18] sm:$0xff]  ;;  %v31_v19 = vsel %vm23_vm0, %v13_v12, 0  ;;  %v16_v39 = vld [vmem:[%s1310_s0 + $0x28] sm:$0xff] }
   0x4   :  { %v25_v10 = vsel %vm23_vm0, %v11_v7, 0  ;;  %918 = vmatprep.subr.mxu0 %v1062_v3  ;;  %v1089_v14 = vsub.f32 %v22_v0, %v1062_v3  ;;  %v1093_v16 = vand.u32 4294901760, %v28_v11  ;;  %v1096_v17 = vsub.f32 %v21_v1, %v1064_v4  ;;  %v15_v38 = vld [vmem:[%s1310_s0 + $0x20] sm:$0xff]  ;;  %v17_v47 = vld [vmem:[%s1310_s0 + $0x30] sm:$0xff]  ;;  %v18_v48 = vld [vmem:[%s1310_s0 + $0x38] sm:$0xff] }
   0x5   :  { %v1091_v15 = vand.u32 4294901760, %v25_v10  ;;  %919 = vmatpush3.msra.mxu0 %v1062_v3  ;;  %v1100_v18 = vsub.f32 %v20_v2, %v1066_v5  ;;  %v34_v20 = vsel %vm23_vm0, %v14_v13, 0  ;;  %v1105_v21 = vsub.f32 %v19_v6, %v1077_v9 }
   0x6   :  { %920 = vmatprep.subr.mxu0 %v1064_v4  ;;  %v1109_v22 = vand.u32 4294901760, %v1089_v14  ;;  %v1115_v24 = vsub.f32 %v28_v11, %v1093_v16  ;;  %v1118_v25 = vand.u32 4294901760, %v1096_v17  ;;  %v1125_v27 = vand.u32 4294901760, %v31_v19 }
   0x7   :  { %v1112_v23 = vsub.f32 %v25_v10, %v1091_v15  ;;  %946 = vmatprep.mubr.f32.mxu1 %v1091_v15  ;;  %921 = vmatpush3.msra.mxu0 %v1064_v4  ;;  %v1123_v26 = vand.u32 4294901760, %v1100_v18  ;;  %v1127_v28 = vand.u32 4294901760, %v34_v20  ;;  %v1130_v29 = vand.u32 4294901760, %v1105_v21 }
   0x8   :  { %922 = vmatprep.subr.mxu0 %v1066_v5  ;;  %v225_v30 = vsub.f32 %v1089_v14, %v1109_v22  ;;  %v129_v32 = vand.u32 4294901760, %v1115_v24  ;;  %v232_v33 = vsub.f32 %v1096_v17, %v1118_v25  ;;  %v1143_v35 = vsub.f32 %v31_v19, %v1125_v27 }
   0x9   :  { %v119_v31 = vand.u32 4294901760, %v1112_v23  ;;  %923 = vmatpush3.msra.mxu0 %v1066_v5  ;;  %v239_v34 = vsub.f32 %v1100_v18, %v1123_v26  ;;  %v1146_v36 = vsub.f32 %v34_v20, %v1127_v28  ;;  %v246_v37 = vsub.f32 %v1105_v21, %v1130_v29 }
   0xa   :  { %924 = vmatprep.subr.mxu0 %v1077_v9  ;;  %v226_v40 = vand.u32 4294901760, %v225_v30  ;;  %v130_v42 = vsub.f32 %v1115_v24, %v129_v32  ;;  %v233_v43 = vand.u32 4294901760, %v232_v33  ;;  %v139_v45 = vand.u32 4294901760, %v1143_v35 }
   0xb   :  { %v120_v41 = vsub.f32 %v1112_v23, %v119_v31  ;;  %925 = vmatpush3.msra.mxu0 %v1077_v9  ;;  %v240_v44 = vand.u32 4294901760, %v239_v34  ;;  %v149_v46 = vand.u32 4294901760, %v1146_v36  ;;  %v37_v51 = vsel %vm23_vm0, %v15_v38, 0 }
   0xc   :  { %938 = vmatprep.subr.mxu1 %v226_v40  ;;  %v131_v50 = vand.u32 4294901760, %v130_v42  ;;  %958 = vmatprep.subr.mxu0 %v1089_v14  ;;  %v40_v52 = vsel %vm23_vm0, %v16_v39, 0  ;;  %v140_v53 = vsub.f32 %v1143_v35, %v139_v45  ;;  %v1181_v55 = vand.u32 4294901760, %v37_v51 }
   0xd   :  { %v121_v49 = vand.u32 4294901760, %v120_v41  ;;  %939 = vmatpush3.msra.mxu1 %v226_v40  ;;  %v150_v54 = vsub.f32 %v1146_v36, %v149_v46  ;;  %v1183_v56 = vand.u32 4294901760, %v40_v52  ;;  %v247_v57 = vand.u32 4294901760, %v246_v37 }
   0xe   :  { %940 = vmatprep.subr.mxu1 %v233_v43  ;;  %v43_v58 = vsel %vm23_vm0, %v17_v47, 0  ;;  %v46_v59 = vsel %vm23_vm0, %v18_v48, 0  ;;  %v141_v60 = vand.u32 4294901760, %v140_v53  ;;  %v1188_v62 = vsub.f32 %v37_v51, %v1181_v55 }
   0xf   :  { %926 = vmatprep.mubr.f32.mxu0 %v121_v49  ;;  %941 = vmatpush3.msra.mxu1 %v233_v43  ;;  %v151_v61 = vand.u32 4294901760, %v150_v54  ;;  %v1191_v63 = vsub.f32 %v40_v52, %v1183_v56  ;;  %v1194_v0 = vand.u32 4294901760, %v43_v58  ;;  %v1196_v1 = vand.u32 4294901760, %v46_v59 }
  0x10   :  { %927 = vmatmul.mubr.f32.vlgmr.msra.gmra.mxu0 %v131_v50  ;;  %942 = vmatprep.subr.mxu1 %v240_v44  ;;  %v159_v2 = vand.u32 4294901760, %v1188_v62 }
  0x11   :  { %959 = vmatpush3.msra.mxu0 %v1089_v14  ;;  %929 = vmatprep.mubr.f32.mxu0 %v141_v60  ;;  %v169_v6 = vand.u32 4294901760, %v1191_v63  ;;  %v1202_v7 = vsub.f32 %v43_v58, %v1194_v0  ;;  %v1205_v8 = vsub.f32 %v46_v59, %v1196_v1 }
  0x12   :  { %943 = vmatpush3.msra.mxu1 %v240_v44  ;;  %960 = vmatprep.subr.mxu0 %v1096_v17  ;;  %v160_v10 = vsub.f32 %v1188_v62, %v159_v2 }
  0x13   :  { %944 = vmatprep.subr.mxu1 %v247_v57  ;;  %v170_v11 = vsub.f32 %v1191_v63, %v169_v6  ;;  %v179_v12 = vand.u32 4294901760, %v1202_v7  ;;  %v189_v13 = vand.u32 4294901760, %v1205_v8  ;;  %961 = vmatpush3.msra.mxu0 %v1096_v17 }
  0x14   :  { %930 = vmatmul.mubr.f32.gmra.mxu0 %v151_v61  ;;  %945 = vmatpush3.msra.mxu1 %v247_v57  ;;  %v161_v14 = vand.u32 4294901760, %v160_v10 }
  0x15   :  { %947 = vmatmul.mubr.f32.vlgmr.msra.gmra.mxu1 %v1093_v16  ;;  %978 = vmatprep.subr.mxu1 %v1062_v3  ;;  %v171_v19 = vand.u32 4294901760, %v170_v11  ;;  %v180_v20 = vsub.f32 %v1202_v7, %v179_v12  ;;  %v190_v30 = vsub.f32 %v1205_v8, %v189_v13 }
  0x16   :  { %979 = vmatpush3.msra.mxu1 %v1062_v3  ;;  %949 = vmatprep.mubr.f32.mxu1 %v1125_v27 }
  0x17   :  { %980 = vmatprep.subr.mxu1 %v1064_v4  ;;  %932 = vmatprep.mubr.f32.mxu0 %v161_v14  ;;  %v181_v33 = vand.u32 4294901760, %v180_v20  ;;  %v191_v34 = vand.u32 4294901760, %v190_v30 }
  0x18   :  { %981 = vmatpush3.msra.mxu1 %v1064_v4  ;;  %933 = vmatmul.mubr.f32.gmra.mxu0 %v171_v19 }
  0x19   :  { %950 = vmatmul.mubr.f32.gmra.mxu1 %v1127_v28  ;;  %962 = vmatprep.subr.mxu0 %v1100_v18 }
  0x1a   :  { %952 = vmatprep.mubr.f32.mxu1 %v1181_v55  ;;  %935 = vmatprep.mubr.f32.mxu0 %v181_v33 }
  0x1b   :  { %963 = vmatpush3.msra.mxu0 %v1100_v18  ;;  %982 = vmatprep.subr.mxu1 %v1066_v5 }
  0x1c   :  { %964 = vmatprep.subr.mxu0 %v1105_v21  ;;  %936 = vmatmul.mubr.f32.gmra.mxu0 %v191_v34 }
  0x1d   :  { %953 = vmatmul.mubr.f32.gmra.mxu1 %v1183_v56  ;;  %965 = vmatpush3.msra.mxu0 %v1105_v21 }
  0x1e   :  { %966 = vmatprep.mubr.f32.mxu0 %v1112_v23  ;;  %983 = vmatpush3.msra.mxu1 %v1066_v5 }
  0x1f   :  { %955 = vmatprep.mubr.f32.mxu1 %v1194_v0  ;;  %984 = vmatprep.subr.mxu1 %v1077_v9 }
  0x20   :  { %998 = vmatprep.subr.mxu0 %v1109_v22  ;;  %967 = vmatmul.mubr.f32.vlgmr.msra.gmra.mxu0 %v1115_v24 }
  0x21   :  { %956 = vmatmul.mubr.f32.gmra.mxu1 %v1196_v1  ;;  %969 = vmatprep.mubr.f32.mxu0 %v1143_v35 }
  0x22   :  { %985 = vmatpush3.msra.mxu1 %v1077_v9  ;;  %986 = vmatprep.mubr.f32.mxu1 %v119_v31 }
  0x23   :  { %999 = vmatpush3.msra.mxu0 %v1109_v22  ;;  %1018 = vmatprep.subr.mxu1 %v1062_v3 }
  0x24   :  { %1000 = vmatprep.subr.mxu0 %v1118_v25  ;;  %970 = vmatmul.mubr.f32.gmra.mxu0 %v1146_v36 }
  0x25   :  { %987 = vmatmul.mubr.f32.vlgmr.msra.gmra.mxu1 %v129_v32  ;;  %972 = vmatprep.mubr.f32.mxu0 %v1188_v62 }
  0x26   :  { %1019 = vmatpush3.msra.mxu1 %v1062_v3  ;;  %989 = vmatprep.mubr.f32.mxu1 %v139_v45 }
  0x27   :  { %1001 = vmatpush3.msra.mxu0 %v1118_v25  ;;  %1020 = vmatprep.subr.mxu1 %v1064_v4 }
  0x28   :  { %1002 = vmatprep.subr.mxu0 %v1123_v26  ;;  %973 = vmatmul.mubr.f32.gmra.mxu0 %v1191_v63 }
  0x29   :  { %990 = vmatmul.mubr.f32.gmra.mxu1 %v149_v46  ;;  %975 = vmatprep.mubr.f32.mxu0 %v1202_v7 }
  0x2a   :  { %1021 = vmatpush3.msra.mxu1 %v1064_v4  ;;  %992 = vmatprep.mubr.f32.mxu1 %v159_v2 }
  0x2b   :  { %1003 = vmatpush3.msra.mxu0 %v1123_v26  ;;  %1022 = vmatprep.subr.mxu1 %v1066_v5 }
  0x2c   :  { %1004 = vmatprep.subr.mxu0 %v1130_v29  ;;  %976 = vmatmul.mubr.f32.gmra.mxu0 %v1205_v8 }
  0x2d   :  { %993 = vmatmul.mubr.f32.gmra.mxu1 %v169_v6  ;;  %1005 = vmatpush3.msra.mxu0 %v1130_v29 }
  0x2e   :  { %1006 = vmatprep.mubr.f32.mxu0 %v1091_v15  ;;  %1023 = vmatpush3.msra.mxu1 %v1066_v5 }
  0x2f   :  { %995 = vmatprep.mubr.f32.mxu1 %v179_v12  ;;  %1024 = vmatprep.subr.mxu1 %v1077_v9 }
  0x30   :  { %1007 = vmatmul.mubr.f32.vlgmr.msra.gmra.mxu0 %v1093_v16  ;;  %1025 = vmatpush3.msra.mxu1 %v1077_v9 }
  0x31   :  { %996 = vmatmul.mubr.f32.gmra.mxu1 %v189_v13  ;;  %1009 = vmatprep.mubr.f32.mxu0 %v1125_v27 }
  0x32   :  { %1026 = vmatprep.mubr.f32.mxu1 %v1091_v15 }
  0x34   :  { %1010 = vmatmul.mubr.f32.gmra.mxu0 %v1127_v28 }
  0x35   :  { %1027 = vmatmul.mubr.f32.vlgmr.msra.gmra.mxu1 %v1093_v16  ;;  %1012 = vmatprep.mubr.f32.mxu0 %v1181_v55 }
  0x36   :  { %1029 = vmatprep.mubr.f32.mxu1 %v1125_v27 }
  0x38   :  { %1013 = vmatmul.mubr.f32.gmra.mxu0 %v1183_v56 }
  0x39   :  { %1030 = vmatmul.mubr.f32.gmra.mxu1 %v1127_v28  ;;  %1015 = vmatprep.mubr.f32.mxu0 %v1194_v0 }
  0x3a   :  { %1032 = vmatprep.mubr.f32.mxu1 %v1181_v55 }
  0x3c   :  { %1016 = vmatmul.mubr.f32.gmra.mxu0 %v1196_v1 }
  0x3d   :  { %1033 = vmatmul.mubr.f32.gmra.mxu1 %v1183_v56 }
  0x3e   :  { %1035 = vmatprep.mubr.f32.mxu1 %v1194_v0 }
  0x41   :  { %1036 = vmatmul.mubr.f32.gmra.mxu1 %v1196_v1 }
  0xd0   :  { %v928_v3 = vpop.f32.mrf.mxu0 }
  0xd2   :  { %v123_v4 = vpop.f32.mrf.mxu0 }
  0xd4   :  { %v931_v5 = vpop.f32.mrf.mxu0 }
  0xd5   :  { %v948_v9 = vpop.f32.mrf.mxu1 }
  0xd6   :  { %v143_v15 = vpop.f32.mrf.mxu0  ;;  %v291_v44 = vadd.f32 %v948_v9, %v928_v3 }
  0xd7   :  { %v284_v16 = vpop.f32.mrf.mxu1 }
  0xd8   :  { %v934_v17 = vpop.f32.mrf.mxu0  ;;  %v285_v47 = vadd.f32 %v284_v16, %v123_v4 }
  0xd9   :  { %v951_v18 = vpop.f32.mrf.mxu1 }
  0xda   :  { %v163_v21 = vpop.f32.mrf.mxu0  ;;  %v303_v51 = vadd.f32 %v951_v18, %v931_v5 }
  0xdb   :  { %v296_v22 = vpop.f32.mrf.mxu1 }
  0xdc   :  { %v937_v23 = vpop.f32.mrf.mxu0  ;;  %v297_v56 = vadd.f32 %v296_v22, %v143_v15 }
  0xdd   :  { %v954_v24 = vpop.f32.mrf.mxu1 }
  0xde   :  { %v183_v25 = vpop.f32.mrf.mxu0  ;;  %v315_v60 = vadd.f32 %v954_v24, %v934_v17 }
  0xdf   :  { %v308_v26 = vpop.f32.mrf.mxu1 }
  0xe0   :  { %v968_v27 = vpop.f32.mrf.mxu0  ;;  %v309_v6 = vadd.f32 %v308_v26, %v163_v21 }
  0xe1   :  { %v957_v28 = vpop.f32.mrf.mxu1  ;;  %v414_v48 = vadd.f32 %v968_v27, %v291_v44 }
  0xe2   :  { %v406_v29 = vpop.f32.mrf.mxu0  ;;  %v327_v14 = vadd.f32 %v957_v28, %v937_v23 }
  0xe3   :  { %v320_v31 = vpop.f32.mrf.mxu1  ;;  %v407_v52 = vadd.f32 %v406_v29, %v285_v47 }
  0xe4   :  { %v971_v32 = vpop.f32.mrf.mxu0  ;;  %v321_v4 = vadd.f32 %v320_v31, %v183_v25 }
  0xe5   :  { %v988_v35 = vpop.f32.mrf.mxu1  ;;  %v428_v57 = vadd.f32 %v971_v32, %v303_v51 }
  0xe6   :  { %v420_v36 = vpop.f32.mrf.mxu0  ;;  %v541_v53 = vadd.f32 %v988_v35, %v414_v48 }
  0xe7   :  { %v532_v37 = vpop.f32.mrf.mxu1  ;;  %v421_v63 = vadd.f32 %v420_v36, %v297_v56 }
  0xe8   :  { %v974_v38 = vpop.f32.mrf.mxu0  ;;  %v533_v58 = vadd.f32 %v532_v37, %v407_v52 }
  0xe9   :  { %v991_v39 = vpop.f32.mrf.mxu1  ;;  %v442_v10 = vadd.f32 %v974_v38, %v315_v60 }
  0xea   :  { %v434_v40 = vpop.f32.mrf.mxu0  ;;  %v557_v0 = vadd.f32 %v991_v39, %v428_v57 }
  0xeb   :  { %v548_v41 = vpop.f32.mrf.mxu1  ;;  %v435_v30 = vadd.f32 %v434_v40, %v309_v6 }
  0xec   :  { %v977_v42 = vpop.f32.mrf.mxu0  ;;  %v549_v11 = vadd.f32 %v548_v41, %v421_v63 }
  0xed   :  { %v994_v43 = vpop.f32.mrf.mxu1  ;;  %v456_v15 = vadd.f32 %v977_v42, %v327_v14 }
  0xee   :  { %v448_v45 = vpop.f32.mrf.mxu0  ;;  %v573_v33 = vadd.f32 %v994_v43, %v442_v10 }
  0xef   :  { %v564_v46 = vpop.f32.mrf.mxu1  ;;  %v449_v23 = vadd.f32 %v448_v45, %v321_v4 }
  0xf0   :  { %v1008_v49 = vpop.f32.mrf.mxu0  ;;  %v565_v16 = vadd.f32 %v564_v46, %v435_v30 }
  0xf1   :  { %v997_v50 = vpop.f32.mrf.mxu1  ;;  %v678_v59 = vadd.f32 %v1008_v49, %v541_v53 }
  0xf2   :  { %v671_v54 = vpop.f32.mrf.mxu0  ;;  %v589_v24 = vadd.f32 %v997_v50, %v456_v15 }
  0xf3   :  { %v580_v55 = vpop.f32.mrf.mxu1  ;;  %v672_v1 = vadd.f32 %v671_v54, %v533_v58 }
  0xf4   :  { %v1011_v61 = vpop.f32.mrf.mxu0  ;;  %v581_v29 = vadd.f32 %v580_v55, %v449_v23 }
  0xf5   :  { %v1028_v62 = vpop.f32.mrf.mxu1  ;;  %v690_v12 = vadd.f32 %v1011_v61, %v557_v0 }
  0xf6   :  { %v795_v2 = vadd.f32 %v1028_v62, %v678_v59  ;;  %v683_v7 = vpop.f32.mrf.mxu0 }
  0xf7   :  { %v788_v8 = vpop.f32.mrf.mxu1  ;;  %v684_v34 = vadd.f32 %v683_v7, %v549_v11 }
  0xf8   :  { %835 = vst [vmem:[%s1311_s2 + $0x8] sm:$0xff] %v795_v2  ;;  %v789_v13 = vadd.f32 %v788_v8, %v672_v1  ;;  %v1014_v19 = vpop.f32.mrf.mxu0 }
  0xf9   :  { %v1031_v20 = vpop.f32.mrf.mxu1  ;;  %v702_v17 = vadd.f32 %v1014_v19, %v573_v33 }
  0xfa   :  { %834 = vst [vmem:[%s1311_s2] sm:$0xff] %v789_v13  ;;  %v807_v3 = vadd.f32 %v1031_v20, %v690_v12  ;;  %v695_v5 = vpop.f32.mrf.mxu0 }
  0xfb   :  { %v800_v9 = vpop.f32.mrf.mxu1  ;;  %v696_v26 = vadd.f32 %v695_v5, %v565_v16 }
  0xfc   :  { %837 = vst [vmem:[%s1311_s2 + $0x18] sm:$0xff] %v807_v3  ;;  %v801_v18 = vadd.f32 %v800_v9, %v684_v34  ;;  %v1017_v21 = vpop.f32.mrf.mxu0 }
  0xfd   :  { %v1034_v22 = vpop.f32.mrf.mxu1  ;;  %v714_v31 = vadd.f32 %v1017_v21, %v589_v24 }
  0xfe   :  { %836 = vst [vmem:[%s1311_s2 + $0x10] sm:$0xff] %v801_v18  ;;  %v819_v25 = vadd.f32 %v1034_v22, %v702_v17  ;;  %v707_v27 = vpop.f32.mrf.mxu0 }
  0xff   :  { %v812_v28 = vpop.f32.mrf.mxu1  ;;  %v708_v36 = vadd.f32 %v707_v27, %v581_v29 }
 0x100   :  { %839 = vst [vmem:[%s1311_s2 + $0x28] sm:$0xff] %v819_v25  ;;  %v813_v32 = vadd.f32 %v812_v28, %v696_v26 }
 0x101   :  { %v1037_v35 = vpop.f32.mrf.mxu1 }
 0x102   :  { %838 = vst [vmem:[%s1311_s2 + $0x20] sm:$0xff] %v813_v32  ;;  %v831_v37 = vadd.f32 %v1037_v35, %v714_v31 }
 0x103   :  { %v824_v38 = vpop.f32.mrf.mxu1 }
 0x104   :  { %841 = vst [vmem:[%s1311_s2 + $0x38] sm:$0xff] %v831_v37  ;;  %v825_v39 = vadd.f32 %v824_v38, %v708_v36 }
 0x106   :  { %840 = vst [vmem:[%s1311_s2 + $0x30] sm:$0xff] %v825_v39 }

</bundles_post_ra>
